<compile_context>
chip_gen: v7x
topology: tpu7x:2x2x1
jax: 0.10.0
libtpu: 0.0.40
codegen_flags: <defaults>
</compile_context>

<pallas_src>
import functools

import jax
import jax.numpy as jnp
from jax import lax
from jax.experimental import pallas as pl
from jax.experimental.pallas import tpu as pltpu

A = 4      # action dim
H = 32     # belief / GRU hidden dim
Z = 32     # conv latent dim
P = 94     # 90 pos-grid bins + 4 orientation bins
M = 16     # CPC MLP hidden
E = 32     # eval MLP hidden
F = 8      # number of future steps f used this call (f <= 30)
N_MLP = 30
OUT_LANES = 128

# ---- GRU pack row offsets (3H = 96 columns) --------------------------------
_WH_ROW = 8                      # wh starts sublane-aligned
_BX_ROW = _WH_ROW + H            # 40: fused (bi + bh) bias for r,z and bi for n
_BHN_ROW = _BX_ROW + 1           # 41: [0 | 0 | b_hn] row, pre-added to h@Wh
_GRU_ROWS = _BHN_ROW + 1         # 42

# ---- eval pack row offsets (128 columns) ------------------------------------
_EW2_ROW = 128                   # ew2 (padded to 128x128) starts here
_EB1_ROW = _EW2_ROW + 128        # 256
_EB2_ROW = _EB1_ROW + 1          # 257
_EVAL_ROWS = 264


def _rup(x, m):
    return ((x + m - 1) // m) * m


def _cpc_layout(f):
    """Row/lane layout of the per-f CPC parameter slab (shared by pack & kernel)."""
    fm = f * M
    lanes = _rup(max(fm, OUT_LANES), 128)
    b1_row = Z + H                       # 64
    w2_row = _rup(b1_row + 1, 8)         # 72
    b2_row = _rup(w2_row + 2 * f, 8)
    rows = _rup(b2_row + 2 * f, 8)
    return fm, lanes, b1_row, w2_row, b2_row, rows


def _cpci_kernel(b_ref, a_ref, zp_ref, zn_ref, ipo_ref,
                 gru_ref, cpc_ref, ev_ref,
                 pn_out_ref, ev_out_ref):
    f = a_ref.shape[0]
    _, _, b1_row, w2_row, b2_row, _ = _cpc_layout(f)

    # ------------------ actionGRU: batch 1, seq f, h0 = b_t ------------------
    wi = gru_ref[0:A, :]                                  # (A, 3H)
    wh = gru_ref[_WH_ROW:_WH_ROW + H, :]                  # (H, 3H)
    bx = gru_ref[_BX_ROW:_BX_ROW + 1, :]                  # (1, 3H)  bi(+bh) fused
    bhn3 = gru_ref[_BHN_ROW:_BHN_ROW + 1, :]              # (1, 3H)  [0|0|b_hn]

    # input projection hoisted out of the recurrence
    x_proj = jnp.dot(a_ref[...], wi, preferred_element_type=jnp.float32) + bx
    xn = x_proj[:, 2 * H:3 * H]                           # (f, H)

    h = b_ref[...]                                        # (1, H)
    h_rows = []
    for t in range(f):                                    # static unroll
        hp = jnp.dot(h, wh, preferred_element_type=jnp.float32) + bhn3   # (1,3H)
        g = x_proj[t:t + 1, :] + hp                       # one fused (1,3H) add
        rz = jax.nn.sigmoid(g[:, 0:2 * H])                # ONE sigmoid for r|z
        r = rz[:, 0:H]
        zg = rz[:, H:2 * H]
        n = jnp.tanh(xn[t:t + 1, :] + r * hp[:, 2 * H:3 * H])
        h = n + zg * (h - n)
        h_rows.append(h)
    a_gru = jnp.concatenate(h_rows, axis=0)               # (f, H)

    # ------- CPC heads: one lane-dense matmul + block-diagonal w2 mask -------
    w1z = cpc_ref[0:Z, :]                                 # (Z, f*M_pad)
    w1h = cpc_ref[Z:Z + H, :]                             # (H, f*M_pad)
    b1 = cpc_ref[b1_row:b1_row + 1, :]                    # (1, f*M_pad)
    w2m = cpc_ref[w2_row:w2_row + 2 * f, :]               # (2f, f*M_pad) block-diag
    b2 = cpc_ref[b2_row:b2_row + 2 * f, 0:OUT_LANES]      # (2f, 128) lane-broadcast

    zz = jnp.concatenate([zp_ref[...], zn_ref[...]], axis=0)            # (2f, Z)
    az = jnp.dot(a_gru, w1h, preferred_element_type=jnp.float32)        # (f, fM)
    hz = jnp.dot(zz, w1z, preferred_element_type=jnp.float32)           # (2f, fM)
    hid = jnp.maximum(hz + jnp.concatenate([az, az], axis=0) + b1, 0.0)
    scores = jnp.sum(hid * w2m, axis=1, keepdims=True)                  # (2f, 1)
    # full 128-lane unmasked store: rows 0..f-1 = pos, f..2f-1 = neg
    pn_out_ref[...] = jnp.broadcast_to(scores, (2 * f, OUT_LANES)) + b2

    # --------------------- evalMLP on cat(b_t, init_pos_ori) -----------------
    ew1b = ev_ref[0:H, :]                                 # (H, 128)
    ew1p = ev_ref[H:H + P, :]                             # (P, 128)
    ew2 = ev_ref[_EW2_ROW:_EW2_ROW + 128, :]              # (128, 128)
    eb1 = ev_ref[_EB1_ROW:_EB1_ROW + 1, :]                # (1, 128)
    eb2 = ev_ref[_EB2_ROW:_EB2_ROW + 1, :]                # (1, 128)

    eh = jnp.maximum(
        jnp.dot(b_ref[...], ew1b, preferred_element_type=jnp.float32)
        + jnp.dot(ipo_ref[...], ew1p, preferred_element_type=jnp.float32)
        + eb1, 0.0)                                       # (1, 128)
    out1 = jax.nn.sigmoid(
        jnp.dot(eh, ew2, preferred_element_type=jnp.float32) + eb2)     # (1, 128)
    ev_out_ref[...] = jnp.broadcast_to(out1, (8, OUT_LANES))


@functools.partial(jax.jit, static_argnames=("f",))
def cpci_action_forward(b_t, a_t, z_pos, z_neg, init_pos_ori,
                        gru_pack, cpc_pack, eval_pack, f):
    vmem = pl.BlockSpec(memory_space=pltpu.MemorySpace.VMEM)
    pn, ev = pl.pallas_call(
        _cpci_kernel,
        out_shape=(jax.ShapeDtypeStruct((2 * f, OUT_LANES), jnp.float32),
                   jax.ShapeDtypeStruct((8, OUT_LANES), jnp.float32)),
        in_specs=[vmem] * 8,
        out_specs=(vmem, vmem),
    )(b_t, a_t, z_pos, z_neg, init_pos_ori, gru_pack, cpc_pack, eval_pack)
    # slice the lane-dense slabs back to the module's output shapes
    return pn[0:f, 0:1], pn[f:2 * f, 0:1], ev[0:1, 0:P]


def pack_params(p, f):
    """Host-side, one-time packing of the tiny parameter arrays into 3 dense refs."""
    # --- GRU: gate order (r, z, n); b_hn kept separate (it sits inside r*(...)).
    wi = jnp.concatenate([p["wir"], p["wiz"], p["win"]], axis=1)          # (A, 3H)
    wi = jnp.pad(wi, ((0, _WH_ROW - A), (0, 0)))                          # (8, 3H)
    wh = jnp.concatenate([p["whr"], p["whz"], p["whn"]], axis=1)          # (H, 3H)
    bx = jnp.concatenate(
        [p["bir"] + p["bhr"], p["biz"] + p["bhz"], p["bin_"]], axis=1)    # (1, 3H)
    bhn3 = jnp.concatenate([jnp.zeros((1, 2 * H), jnp.float32), p["bhn"]], axis=1)
    gru = jnp.concatenate([wi, wh, bx, bhn3], axis=0)                     # (42, 3H)

    # --- CPC MLPs: only the f used heads, packed block-column into 128 lanes.
    fm, lanes, b1_row, w2_row, b2_row, rows = _cpc_layout(f)
    w1z = jnp.transpose(p["w1z"][:f], (1, 0, 2)).reshape(Z, fm)           # (Z, fM)
    w1h = jnp.transpose(p["w1h"][:f], (1, 0, 2)).reshape(H, fm)           # (H, fM)
    b1 = p["b1"][:f].reshape(1, fm)                                       # (1, fM)
    w2m = (jnp.eye(f, dtype=jnp.float32)[:, :, None]
           * p["w2"][:f][None, :, :]).reshape(f, fm)                      # block-diag
    w2m = jnp.concatenate([w2m, w2m], axis=0)                             # (2f, fM)
    pad = lanes - fm
    if pad:
        pz = lambda x: jnp.pad(x, ((0, 0), (0, pad)))
        w1z, w1h, b1, w2m = pz(w1z), pz(w1h), pz(b1), pz(w2m)
    b2 = jnp.concatenate([p["b2"][:f], p["b2"][:f]], axis=0)              # (2f, 1)
    b2 = jnp.broadcast_to(b2, (2 * f, lanes))
    cpc = jnp.zeros((rows, lanes), jnp.float32)
    cpc = cpc.at[0:Z].set(w1z).at[Z:Z + H].set(w1h)
    cpc = cpc.at[b1_row:b1_row + 1].set(b1)
    cpc = cpc.at[w2_row:w2_row + 2 * f].set(w2m)
    cpc = cpc.at[b2_row:b2_row + 2 * f].set(b2)

    # --- evalMLP: lane-padded to 128 so every kernel slice / store is dense.
    ew1b = jnp.pad(p["ew1b"], ((0, 0), (0, 128 - E)))                     # (H, 128)
    ew1p = jnp.pad(p["ew1p"], ((0, _EW2_ROW - H - P), (0, 128 - E)))      # (96, 128)
    ew2 = jnp.pad(p["ew2"], ((0, 128 - E), (0, 128 - P)))                 # (128, 128)
    eb1 = jnp.pad(p["eb1"], ((0, 0), (0, 128 - E)))                       # (1, 128)
    eb2 = jnp.pad(p["eb2"], ((0, 0), (0, 128 - P)))                       # (1, 128)
    ev = jnp.concatenate([ew1b, ew1p, ew2, eb1, eb2], axis=0)             # (258, 128)
    ev = jnp.pad(ev, ((0, _EVAL_ROWS - ev.shape[0]), (0, 0)))             # (264, 128)

    return gru, cpc, ev


def make_params(key):
    ks = jax.random.split(key, 22)
    rn = lambda k, s: jax.random.normal(k, s, jnp.float32) * 0.1
    return dict(
        # actionGRU nn.GRU(A, H, batch_first=True), gate order (r, z, n), [in,out]
        wir=rn(ks[0], (A, H)), wiz=rn(ks[1], (A, H)), win=rn(ks[2], (A, H)),
        whr=rn(ks[3], (H, H)), whz=rn(ks[4], (H, H)), whn=rn(ks[5], (H, H)),
        bir=rn(ks[6], (1, H)), biz=rn(ks[7], (1, H)), bin_=rn(ks[8], (1, H)),
        bhr=rn(ks[9], (1, H)), bhz=rn(ks[10], (1, H)), bhn=rn(ks[11], (1, H)),
        # 30 CPC MLPs: Linear(Z+H, M) -> ReLU -> Linear(M, 1)
        w1z=rn(ks[12], (N_MLP, Z, M)), w1h=rn(ks[13], (N_MLP, H, M)),
        b1=rn(ks[14], (N_MLP, M)), w2=rn(ks[15], (N_MLP, M)), b2=rn(ks[16], (N_MLP, 1)),
        # evalMLP: Linear(H+P, E) -> ReLU -> Linear(E, P) -> Sigmoid
        ew1b=rn(ks[17], (H, E)), ew1p=rn(ks[18], (P, E)), eb1=rn(ks[19], (1, E)),
        ew2=rn(ks[20], (E, P)), eb2=rn(ks[21], (1, P)),
    )


def reference_forward(b_t, a_t, z_pos, z_neg, ipo, params, f):
    """Pure-JAX reference (same math, no Pallas)."""
    def gru_step(h, x):
        r = jax.nn.sigmoid(x @ params["wir"] + params["bir"] + h @ params["whr"] + params["bhr"])
        zg = jax.nn.sigmoid(x @ params["wiz"] + params["biz"] + h @ params["whz"] + params["bhz"])
        n = jnp.tanh(x @ params["win"] + params["bin_"] + r * (h @ params["whn"] + params["bhn"]))
        h_new = (1.0 - zg) * n + zg * h
        return h_new, h_new[0]

    _, a_gru = lax.scan(gru_step, b_t, a_t[:, None, :])               # (f, H)

    def mlp(z_rows):
        hid = jnp.maximum(
            jnp.einsum("fd,fdm->fm", z_rows, params["w1z"][:f])
            + jnp.einsum("fd,fdm->fm", a_gru, params["w1h"][:f])
            + params["b1"][:f], 0.0)
        return jnp.sum(hid * params["w2"][:f], axis=1, keepdims=True) + params["b2"][:f]

    pp, pn = mlp(z_pos), mlp(z_neg)
    eh = jnp.maximum(b_t @ params["ew1b"] + ipo @ params["ew1p"] + params["eb1"], 0.0)
    pxy = jax.nn.sigmoid(eh @ params["ew2"] + params["eb2"])
    return pp, pn, pxy


if __name__ == "__main__":
    key = jax.random.PRNGKey(0)
    k_in, k_par = jax.random.split(key)
    ki = jax.random.split(k_in, 5)

    b_t = jax.random.normal(ki[0], (1, H), jnp.float32)            # belief at t
    a_t = jax.random.normal(ki[1], (F, A), jnp.float32)            # f future actions
    z_pos = jax.random.normal(ki[2], (F, Z), jnp.float32)          # positive latents
    z_neg = jax.random.normal(ki[3], (F, Z), jnp.float32)          # negative latents
    init_pos_ori = jax.random.uniform(ki[4], (1, P), jnp.float32)  # pos-grid + ori

    params = make_params(k_par)
    gru_pack, cpc_pack, eval_pack = pack_params(params, F)         # one-time packing

    pred_pos, pred_neg, pred_xytheta = cpci_action_forward(
        b_t, a_t, z_pos, z_neg, init_pos_ori, gru_pack, cpc_pack, eval_pack, F)
    jax.block_until_ready((pred_pos, pred_neg, pred_xytheta))

    rp, rn_, rx = reference_forward(b_t, a_t, z_pos, z_neg, init_pos_ori, params, F)
    assert pred_pos.shape == (F, 1) and pred_neg.shape == (F, 1) and pred_xytheta.shape == (1, P)
    assert jnp.allclose(pred_pos, rp, rtol=1e-2, atol=1e-2)
    assert jnp.allclose(pred_neg, rn_, rtol=1e-2, atol=1e-2)
    assert jnp.allclose(pred_xytheta, rx, rtol=1e-2, atol=1e-2)

    print("KERNEL_OK")
</pallas_src>

<mosaic_0001>
module attributes {stable_mosaic.version = 11 : i64} {
  func.func @_cpci_kernel(%arg0: memref<1x32xf32, #tpu.memory_space<vmem>>, %arg1: memref<8x4xf32, #tpu.memory_space<vmem>>, %arg2: memref<8x32xf32, #tpu.memory_space<vmem>>, %arg3: memref<8x32xf32, #tpu.memory_space<vmem>>, %arg4: memref<1x94xf32, #tpu.memory_space<vmem>>, %arg5: memref<42x96xf32, #tpu.memory_space<vmem>>, %arg6: memref<104x128xf32, #tpu.memory_space<vmem>>, %arg7: memref<264x128xf32, #tpu.memory_space<vmem>>, %arg8: memref<16x128xf32, #tpu.memory_space<vmem>>, %arg9: memref<8x128xf32, #tpu.memory_space<vmem>>) attributes {dimension_semantics = [], scalar_prefetch = 0 : i64, scratch_operands = 0 : i64, tpu.core_type = #tpu.core_type<tc>} {
    %c0 = arith.constant 0 : index
    %c0_0 = arith.constant 0 : index
    %0 = vector.load %arg5[%c0, %c0_0] : memref<42x96xf32, #tpu.memory_space<vmem>>, vector<4x96xf32>
    %c8 = arith.constant 8 : index
    %c0_1 = arith.constant 0 : index
    %1 = vector.load %arg5[%c8, %c0_1] : memref<42x96xf32, #tpu.memory_space<vmem>>, vector<32x96xf32>
    %c40 = arith.constant 40 : index
    %c0_2 = arith.constant 0 : index
    %2 = vector.load %arg5[%c40, %c0_2] : memref<42x96xf32, #tpu.memory_space<vmem>>, vector<1x96xf32>
    %c41 = arith.constant 41 : index
    %c0_3 = arith.constant 0 : index
    %3 = vector.load %arg5[%c41, %c0_3] : memref<42x96xf32, #tpu.memory_space<vmem>>, vector<1x96xf32>
    %c0_4 = arith.constant 0 : index
    %c0_5 = arith.constant 0 : index
    %4 = vector.load %arg1[%c0_4, %c0_5] : memref<8x4xf32, #tpu.memory_space<vmem>>, vector<8x4xf32>
    %cst = arith.constant dense<0.000000e+00> : vector<8x96xf32>
    %5 = tpu.matmul %4, %0, %cst {dimension_numbers = #tpu.dot_dimension_numbers<[1], [0], [0], [1], [0, 0, 1, 1], [], []>} : vector<8x4xf32>, vector<4x96xf32>, vector<8x96xf32> -> vector<8x96xf32>
    %6 = vector.broadcast %2 : vector<1x96xf32> to vector<8x96xf32>
    %7 = arith.addf %5, %6 : vector<8x96xf32>
    %8 = vector.extract_strided_slice %7 {offsets = [0, 64], sizes = [8, 32], strides = [1, 1]} : vector<8x96xf32> to vector<8x32xf32>
    %c0_6 = arith.constant 0 : index
    %c0_7 = arith.constant 0 : index
    %9 = vector.load %arg0[%c0_6, %c0_7] : memref<1x32xf32, #tpu.memory_space<vmem>>, vector<1x32xf32>
    %cst_8 = arith.constant dense<0.000000e+00> : vector<1x96xf32>
    %10 = tpu.matmul %9, %1, %cst_8 {dimension_numbers = #tpu.dot_dimension_numbers<[1], [0], [0], [1], [0, 0, 1, 1], [], []>} : vector<1x32xf32>, vector<32x96xf32>, vector<1x96xf32> -> vector<1x96xf32>
    %11 = arith.addf %10, %3 : vector<1x96xf32>
    %12 = vector.extract_strided_slice %7 {offsets = [0, 0], sizes = [1, 96], strides = [1, 1]} : vector<8x96xf32> to vector<1x96xf32>
    %13 = arith.addf %12, %11 : vector<1x96xf32>
    %14 = vector.extract_strided_slice %13 {offsets = [0, 0], sizes = [1, 64], strides = [1, 1]} : vector<1x96xf32> to vector<1x64xf32>
    %15 = arith.negf %14 : vector<1x64xf32>
    %16 = math.exp %15 : vector<1x64xf32>
    %cst_9 = arith.constant 1.000000e+00 : f32
    %17 = vector.broadcast %cst_9 : f32 to vector<1x64xf32>
    %18 = arith.addf %17, %16 : vector<1x64xf32>
    %19 = arith.divf %17, %18 : vector<1x64xf32>
    %20 = vector.extract_strided_slice %19 {offsets = [0, 0], sizes = [1, 32], strides = [1, 1]} : vector<1x64xf32> to vector<1x32xf32>
    %21 = vector.extract_strided_slice %19 {offsets = [0, 32], sizes = [1, 32], strides = [1, 1]} : vector<1x64xf32> to vector<1x32xf32>
    %22 = vector.extract_strided_slice %8 {offsets = [0, 0], sizes = [1, 32], strides = [1, 1]} : vector<8x32xf32> to vector<1x32xf32>
    %23 = vector.extract_strided_slice %11 {offsets = [0, 64], sizes = [1, 32], strides = [1, 1]} : vector<1x96xf32> to vector<1x32xf32>
    %24 = arith.mulf %20, %23 : vector<1x32xf32>
    %25 = arith.addf %22, %24 : vector<1x32xf32>
    %26 = math.tanh %25 : vector<1x32xf32>
    %27 = arith.subf %9, %26 : vector<1x32xf32>
    %28 = arith.mulf %21, %27 : vector<1x32xf32>
    %29 = arith.addf %26, %28 : vector<1x32xf32>
    %cst_10 = arith.constant dense<0.000000e+00> : vector<1x96xf32>
    %30 = tpu.matmul %29, %1, %cst_10 {dimension_numbers = #tpu.dot_dimension_numbers<[1], [0], [0], [1], [0, 0, 1, 1], [], []>} : vector<1x32xf32>, vector<32x96xf32>, vector<1x96xf32> -> vector<1x96xf32>
    %31 = arith.addf %30, %3 : vector<1x96xf32>
    %32 = vector.extract_strided_slice %7 {offsets = [1, 0], sizes = [1, 96], strides = [1, 1]} : vector<8x96xf32> to vector<1x96xf32>
    %33 = arith.addf %32, %31 : vector<1x96xf32>
    %34 = vector.extract_strided_slice %33 {offsets = [0, 0], sizes = [1, 64], strides = [1, 1]} : vector<1x96xf32> to vector<1x64xf32>
    %35 = arith.negf %34 : vector<1x64xf32>
    %36 = math.exp %35 : vector<1x64xf32>
    %cst_11 = arith.constant 1.000000e+00 : f32
    %37 = vector.broadcast %cst_11 : f32 to vector<1x64xf32>
    %38 = arith.addf %37, %36 : vector<1x64xf32>
    %39 = arith.divf %37, %38 : vector<1x64xf32>
    %40 = vector.extract_strided_slice %39 {offsets = [0, 0], sizes = [1, 32], strides = [1, 1]} : vector<1x64xf32> to vector<1x32xf32>
    %41 = vector.extract_strided_slice %39 {offsets = [0, 32], sizes = [1, 32], strides = [1, 1]} : vector<1x64xf32> to vector<1x32xf32>
    %42 = vector.extract_strided_slice %8 {offsets = [1, 0], sizes = [1, 32], strides = [1, 1]} : vector<8x32xf32> to vector<1x32xf32>
    %43 = vector.extract_strided_slice %31 {offsets = [0, 64], sizes = [1, 32], strides = [1, 1]} : vector<1x96xf32> to vector<1x32xf32>
    %44 = arith.mulf %40, %43 : vector<1x32xf32>
    %45 = arith.addf %42, %44 : vector<1x32xf32>
    %46 = math.tanh %45 : vector<1x32xf32>
    %47 = arith.subf %29, %46 : vector<1x32xf32>
    %48 = arith.mulf %41, %47 : vector<1x32xf32>
    %49 = arith.addf %46, %48 : vector<1x32xf32>
    %cst_12 = arith.constant dense<0.000000e+00> : vector<1x96xf32>
    %50 = tpu.matmul %49, %1, %cst_12 {dimension_numbers = #tpu.dot_dimension_numbers<[1], [0], [0], [1], [0, 0, 1, 1], [], []>} : vector<1x32xf32>, vector<32x96xf32>, vector<1x96xf32> -> vector<1x96xf32>
    %51 = arith.addf %50, %3 : vector<1x96xf32>
    %52 = vector.extract_strided_slice %7 {offsets = [2, 0], sizes = [1, 96], strides = [1, 1]} : vector<8x96xf32> to vector<1x96xf32>
    %53 = arith.addf %52, %51 : vector<1x96xf32>
    %54 = vector.extract_strided_slice %53 {offsets = [0, 0], sizes = [1, 64], strides = [1, 1]} : vector<1x96xf32> to vector<1x64xf32>
    %55 = arith.negf %54 : vector<1x64xf32>
    %56 = math.exp %55 : vector<1x64xf32>
    %cst_13 = arith.constant 1.000000e+00 : f32
    %57 = vector.broadcast %cst_13 : f32 to vector<1x64xf32>
    %58 = arith.addf %57, %56 : vector<1x64xf32>
    %59 = arith.divf %57, %58 : vector<1x64xf32>
    %60 = vector.extract_strided_slice %59 {offsets = [0, 0], sizes = [1, 32], strides = [1, 1]} : vector<1x64xf32> to vector<1x32xf32>
    %61 = vector.extract_strided_slice %59 {offsets = [0, 32], sizes = [1, 32], strides = [1, 1]} : vector<1x64xf32> to vector<1x32xf32>
    %62 = vector.extract_strided_slice %8 {offsets = [2, 0], sizes = [1, 32], strides = [1, 1]} : vector<8x32xf32> to vector<1x32xf32>
    %63 = vector.extract_strided_slice %51 {offsets = [0, 64], sizes = [1, 32], strides = [1, 1]} : vector<1x96xf32> to vector<1x32xf32>
    %64 = arith.mulf %60, %63 : vector<1x32xf32>
    %65 = arith.addf %62, %64 : vector<1x32xf32>
    %66 = math.tanh %65 : vector<1x32xf32>
    %67 = arith.subf %49, %66 : vector<1x32xf32>
    %68 = arith.mulf %61, %67 : vector<1x32xf32>
    %69 = arith.addf %66, %68 : vector<1x32xf32>
    %cst_14 = arith.constant dense<0.000000e+00> : vector<1x96xf32>
    %70 = tpu.matmul %69, %1, %cst_14 {dimension_numbers = #tpu.dot_dimension_numbers<[1], [0], [0], [1], [0, 0, 1, 1], [], []>} : vector<1x32xf32>, vector<32x96xf32>, vector<1x96xf32> -> vector<1x96xf32>
    %71 = arith.addf %70, %3 : vector<1x96xf32>
    %72 = vector.extract_strided_slice %7 {offsets = [3, 0], sizes = [1, 96], strides = [1, 1]} : vector<8x96xf32> to vector<1x96xf32>
    %73 = arith.addf %72, %71 : vector<1x96xf32>
    %74 = vector.extract_strided_slice %73 {offsets = [0, 0], sizes = [1, 64], strides = [1, 1]} : vector<1x96xf32> to vector<1x64xf32>
    %75 = arith.negf %74 : vector<1x64xf32>
    %76 = math.exp %75 : vector<1x64xf32>
    %cst_15 = arith.constant 1.000000e+00 : f32
    %77 = vector.broadcast %cst_15 : f32 to vector<1x64xf32>
    %78 = arith.addf %77, %76 : vector<1x64xf32>
    %79 = arith.divf %77, %78 : vector<1x64xf32>
    %80 = vector.extract_strided_slice %79 {offsets = [0, 0], sizes = [1, 32], strides = [1, 1]} : vector<1x64xf32> to vector<1x32xf32>
    %81 = vector.extract_strided_slice %79 {offsets = [0, 32], sizes = [1, 32], strides = [1, 1]} : vector<1x64xf32> to vector<1x32xf32>
    %82 = vector.extract_strided_slice %8 {offsets = [3, 0], sizes = [1, 32], strides = [1, 1]} : vector<8x32xf32> to vector<1x32xf32>
    %83 = vector.extract_strided_slice %71 {offsets = [0, 64], sizes = [1, 32], strides = [1, 1]} : vector<1x96xf32> to vector<1x32xf32>
    %84 = arith.mulf %80, %83 : vector<1x32xf32>
    %85 = arith.addf %82, %84 : vector<1x32xf32>
    %86 = math.tanh %85 : vector<1x32xf32>
    %87 = arith.subf %69, %86 : vector<1x32xf32>
    %88 = arith.mulf %81, %87 : vector<1x32xf32>
    %89 = arith.addf %86, %88 : vector<1x32xf32>
    %cst_16 = arith.constant dense<0.000000e+00> : vector<1x96xf32>
    %90 = tpu.matmul %89, %1, %cst_16 {dimension_numbers = #tpu.dot_dimension_numbers<[1], [0], [0], [1], [0, 0, 1, 1], [], []>} : vector<1x32xf32>, vector<32x96xf32>, vector<1x96xf32> -> vector<1x96xf32>
    %91 = arith.addf %90, %3 : vector<1x96xf32>
    %92 = vector.extract_strided_slice %7 {offsets = [4, 0], sizes = [1, 96], strides = [1, 1]} : vector<8x96xf32> to vector<1x96xf32>
    %93 = arith.addf %92, %91 : vector<1x96xf32>
    %94 = vector.extract_strided_slice %93 {offsets = [0, 0], sizes = [1, 64], strides = [1, 1]} : vector<1x96xf32> to vector<1x64xf32>
    %95 = arith.negf %94 : vector<1x64xf32>
    %96 = math.exp %95 : vector<1x64xf32>
    %cst_17 = arith.constant 1.000000e+00 : f32
    %97 = vector.broadcast %cst_17 : f32 to vector<1x64xf32>
    %98 = arith.addf %97, %96 : vector<1x64xf32>
    %99 = arith.divf %97, %98 : vector<1x64xf32>
    %100 = vector.extract_strided_slice %99 {offsets = [0, 0], sizes = [1, 32], strides = [1, 1]} : vector<1x64xf32> to vector<1x32xf32>
    %101 = vector.extract_strided_slice %99 {offsets = [0, 32], sizes = [1, 32], strides = [1, 1]} : vector<1x64xf32> to vector<1x32xf32>
    %102 = vector.extract_strided_slice %8 {offsets = [4, 0], sizes = [1, 32], strides = [1, 1]} : vector<8x32xf32> to vector<1x32xf32>
    %103 = vector.extract_strided_slice %91 {offsets = [0, 64], sizes = [1, 32], strides = [1, 1]} : vector<1x96xf32> to vector<1x32xf32>
    %104 = arith.mulf %100, %103 : vector<1x32xf32>
    %105 = arith.addf %102, %104 : vector<1x32xf32>
    %106 = math.tanh %105 : vector<1x32xf32>
    %107 = arith.subf %89, %106 : vector<1x32xf32>
    %108 = arith.mulf %101, %107 : vector<1x32xf32>
    %109 = arith.addf %106, %108 : vector<1x32xf32>
    %cst_18 = arith.constant dense<0.000000e+00> : vector<1x96xf32>
    %110 = tpu.matmul %109, %1, %cst_18 {dimension_numbers = #tpu.dot_dimension_numbers<[1], [0], [0], [1], [0, 0, 1, 1], [], []>} : vector<1x32xf32>, vector<32x96xf32>, vector<1x96xf32> -> vector<1x96xf32>
    %111 = arith.addf %110, %3 : vector<1x96xf32>
    %112 = vector.extract_strided_slice %7 {offsets = [5, 0], sizes = [1, 96], strides = [1, 1]} : vector<8x96xf32> to vector<1x96xf32>
    %113 = arith.addf %112, %111 : vector<1x96xf32>
    %114 = vector.extract_strided_slice %113 {offsets = [0, 0], sizes = [1, 64], strides = [1, 1]} : vector<1x96xf32> to vector<1x64xf32>
    %115 = arith.negf %114 : vector<1x64xf32>
    %116 = math.exp %115 : vector<1x64xf32>
    %cst_19 = arith.constant 1.000000e+00 : f32
    %117 = vector.broadcast %cst_19 : f32 to vector<1x64xf32>
    %118 = arith.addf %117, %116 : vector<1x64xf32>
    %119 = arith.divf %117, %118 : vector<1x64xf32>
    %120 = vector.extract_strided_slice %119 {offsets = [0, 0], sizes = [1, 32], strides = [1, 1]} : vector<1x64xf32> to vector<1x32xf32>
    %121 = vector.extract_strided_slice %119 {offsets = [0, 32], sizes = [1, 32], strides = [1, 1]} : vector<1x64xf32> to vector<1x32xf32>
    %122 = vector.extract_strided_slice %8 {offsets = [5, 0], sizes = [1, 32], strides = [1, 1]} : vector<8x32xf32> to vector<1x32xf32>
    %123 = vector.extract_strided_slice %111 {offsets = [0, 64], sizes = [1, 32], strides = [1, 1]} : vector<1x96xf32> to vector<1x32xf32>
    %124 = arith.mulf %120, %123 : vector<1x32xf32>
    %125 = arith.addf %122, %124 : vector<1x32xf32>
    %126 = math.tanh %125 : vector<1x32xf32>
    %127 = arith.subf %109, %126 : vector<1x32xf32>
    %128 = arith.mulf %121, %127 : vector<1x32xf32>
    %129 = arith.addf %126, %128 : vector<1x32xf32>
    %cst_20 = arith.constant dense<0.000000e+00> : vector<1x96xf32>
    %130 = tpu.matmul %129, %1, %cst_20 {dimension_numbers = #tpu.dot_dimension_numbers<[1], [0], [0], [1], [0, 0, 1, 1], [], []>} : vector<1x32xf32>, vector<32x96xf32>, vector<1x96xf32> -> vector<1x96xf32>
    %131 = arith.addf %130, %3 : vector<1x96xf32>
    %132 = vector.extract_strided_slice %7 {offsets = [6, 0], sizes = [1, 96], strides = [1, 1]} : vector<8x96xf32> to vector<1x96xf32>
    %133 = arith.addf %132, %131 : vector<1x96xf32>
    %134 = vector.extract_strided_slice %133 {offsets = [0, 0], sizes = [1, 64], strides = [1, 1]} : vector<1x96xf32> to vector<1x64xf32>
    %135 = arith.negf %134 : vector<1x64xf32>
    %136 = math.exp %135 : vector<1x64xf32>
    %cst_21 = arith.constant 1.000000e+00 : f32
    %137 = vector.broadcast %cst_21 : f32 to vector<1x64xf32>
    %138 = arith.addf %137, %136 : vector<1x64xf32>
    %139 = arith.divf %137, %138 : vector<1x64xf32>
    %140 = vector.extract_strided_slice %139 {offsets = [0, 0], sizes = [1, 32], strides = [1, 1]} : vector<1x64xf32> to vector<1x32xf32>
    %141 = vector.extract_strided_slice %139 {offsets = [0, 32], sizes = [1, 32], strides = [1, 1]} : vector<1x64xf32> to vector<1x32xf32>
    %142 = vector.extract_strided_slice %8 {offsets = [6, 0], sizes = [1, 32], strides = [1, 1]} : vector<8x32xf32> to vector<1x32xf32>
    %143 = vector.extract_strided_slice %131 {offsets = [0, 64], sizes = [1, 32], strides = [1, 1]} : vector<1x96xf32> to vector<1x32xf32>
    %144 = arith.mulf %140, %143 : vector<1x32xf32>
    %145 = arith.addf %142, %144 : vector<1x32xf32>
    %146 = math.tanh %145 : vector<1x32xf32>
    %147 = arith.subf %129, %146 : vector<1x32xf32>
    %148 = arith.mulf %141, %147 : vector<1x32xf32>
    %149 = arith.addf %146, %148 : vector<1x32xf32>
    %cst_22 = arith.constant dense<0.000000e+00> : vector<1x96xf32>
    %150 = tpu.matmul %149, %1, %cst_22 {dimension_numbers = #tpu.dot_dimension_numbers<[1], [0], [0], [1], [0, 0, 1, 1], [], []>} : vector<1x32xf32>, vector<32x96xf32>, vector<1x96xf32> -> vector<1x96xf32>
    %151 = arith.addf %150, %3 : vector<1x96xf32>
    %152 = vector.extract_strided_slice %7 {offsets = [7, 0], sizes = [1, 96], strides = [1, 1]} : vector<8x96xf32> to vector<1x96xf32>
    %153 = arith.addf %152, %151 : vector<1x96xf32>
    %154 = vector.extract_strided_slice %153 {offsets = [0, 0], sizes = [1, 64], strides = [1, 1]} : vector<1x96xf32> to vector<1x64xf32>
    %155 = arith.negf %154 : vector<1x64xf32>
    %156 = math.exp %155 : vector<1x64xf32>
    %cst_23 = arith.constant 1.000000e+00 : f32
    %157 = vector.broadcast %cst_23 : f32 to vector<1x64xf32>
    %158 = arith.addf %157, %156 : vector<1x64xf32>
    %159 = arith.divf %157, %158 : vector<1x64xf32>
    %160 = vector.extract_strided_slice %159 {offsets = [0, 0], sizes = [1, 32], strides = [1, 1]} : vector<1x64xf32> to vector<1x32xf32>
    %161 = vector.extract_strided_slice %159 {offsets = [0, 32], sizes = [1, 32], strides = [1, 1]} : vector<1x64xf32> to vector<1x32xf32>
    %162 = vector.extract_strided_slice %8 {offsets = [7, 0], sizes = [1, 32], strides = [1, 1]} : vector<8x32xf32> to vector<1x32xf32>
    %163 = vector.extract_strided_slice %151 {offsets = [0, 64], sizes = [1, 32], strides = [1, 1]} : vector<1x96xf32> to vector<1x32xf32>
    %164 = arith.mulf %160, %163 : vector<1x32xf32>
    %165 = arith.addf %162, %164 : vector<1x32xf32>
    %166 = math.tanh %165 : vector<1x32xf32>
    %167 = arith.subf %149, %166 : vector<1x32xf32>
    %168 = arith.mulf %161, %167 : vector<1x32xf32>
    %169 = arith.addf %166, %168 : vector<1x32xf32>
    %170 = tpu.concatenate %29, %49, %69, %89, %109, %129, %149, %169 in 0 : vector<1x32xf32>, vector<1x32xf32>, vector<1x32xf32>, vector<1x32xf32>, vector<1x32xf32>, vector<1x32xf32>, vector<1x32xf32>, vector<1x32xf32> -> vector<8x32xf32>
    %c0_24 = arith.constant 0 : index
    %c0_25 = arith.constant 0 : index
    %171 = vector.load %arg6[%c0_24, %c0_25] : memref<104x128xf32, #tpu.memory_space<vmem>>, vector<32x128xf32>
    %c32 = arith.constant 32 : index
    %c0_26 = arith.constant 0 : index
    %172 = vector.load %arg6[%c32, %c0_26] : memref<104x128xf32, #tpu.memory_space<vmem>>, vector<32x128xf32>
    %c64 = arith.constant 64 : index
    %c0_27 = arith.constant 0 : index
    %173 = vector.load %arg6[%c64, %c0_27] : memref<104x128xf32, #tpu.memory_space<vmem>>, vector<1x128xf32>
    %c72 = arith.constant 72 : index
    %c0_28 = arith.constant 0 : index
    %174 = vector.load %arg6[%c72, %c0_28] : memref<104x128xf32, #tpu.memory_space<vmem>>, vector<16x128xf32>
    %c88 = arith.constant 88 : index
    %c0_29 = arith.constant 0 : index
    %175 = vector.load %arg6[%c88, %c0_29] : memref<104x128xf32, #tpu.memory_space<vmem>>, vector<16x128xf32>
    %c0_30 = arith.constant 0 : index
    %c0_31 = arith.constant 0 : index
    %176 = vector.load %arg2[%c0_30, %c0_31] : memref<8x32xf32, #tpu.memory_space<vmem>>, vector<8x32xf32>
    %c0_32 = arith.constant 0 : index
    %c0_33 = arith.constant 0 : index
    %177 = vector.load %arg3[%c0_32, %c0_33] : memref<8x32xf32, #tpu.memory_space<vmem>>, vector<8x32xf32>
    %178 = tpu.concatenate %176, %177 in 0 : vector<8x32xf32>, vector<8x32xf32> -> vector<16x32xf32>
    %cst_34 = arith.constant dense<0.000000e+00> : vector<8x128xf32>
    %179 = tpu.matmul %170, %172, %cst_34 {dimension_numbers = #tpu.dot_dimension_numbers<[1], [0], [0], [1], [0, 0, 1, 1], [], []>} : vector<8x32xf32>, vector<32x128xf32>, vector<8x128xf32> -> vector<8x128xf32>
    %cst_35 = arith.constant dense<0.000000e+00> : vector<16x128xf32>
    %180 = tpu.matmul %178, %171, %cst_35 {dimension_numbers = #tpu.dot_dimension_numbers<[1], [0], [0], [1], [0, 0, 1, 1], [], []>} : vector<16x32xf32>, vector<32x128xf32>, vector<16x128xf32> -> vector<16x128xf32>
    %181 = tpu.concatenate %179, %179 in 0 : vector<8x128xf32>, vector<8x128xf32> -> vector<16x128xf32>
    %182 = arith.addf %180, %181 : vector<16x128xf32>
    %183 = vector.broadcast %173 : vector<1x128xf32> to vector<16x128xf32>
    %184 = arith.addf %182, %183 : vector<16x128xf32>
    %cst_36 = arith.constant 0.000000e+00 : f32
    %185 = vector.broadcast %cst_36 : f32 to vector<16x128xf32>
    %186 = arith.maximumf %184, %185 : vector<16x128xf32>
    %187 = arith.mulf %186, %174 : vector<16x128xf32>
    %cst_37 = arith.constant dense<0.000000e+00> : vector<16xf32>
    %188 = vector.multi_reduction <add>, %187, %cst_37 [1] : vector<16x128xf32> to vector<16xf32>
    %189 = vector.shape_cast %188 : vector<16xf32> to vector<16x1xf32>
    %190 = vector.shape_cast %189 : vector<16x1xf32> to vector<16x1xf32>
    %191 = vector.broadcast %190 : vector<16x1xf32> to vector<16x128xf32>
    %192 = arith.addf %191, %175 : vector<16x128xf32>
    %c0_38 = arith.constant 0 : index
    %c0_39 = arith.constant 0 : index
    %193 = vector.load %arg8[%c0_38, %c0_39] : memref<16x128xf32, #tpu.memory_space<vmem>>, vector<16x128xf32>
    tpu.vector_store %arg8[%c0_38, %c0_39], %192 {strides = array<i32>} : memref<16x128xf32, #tpu.memory_space<vmem>>, vector<16x128xf32>,
    %c0_40 = arith.constant 0 : index
    %c0_41 = arith.constant 0 : index
    %194 = vector.load %arg7[%c0_40, %c0_41] : memref<264x128xf32, #tpu.memory_space<vmem>>, vector<32x128xf32>
    %c32_42 = arith.constant 32 : index
    %c0_43 = arith.constant 0 : index
    %195 = vector.load %arg7[%c32_42, %c0_43] : memref<264x128xf32, #tpu.memory_space<vmem>>, vector<94x128xf32>
    %c128 = arith.constant 128 : index
    %c0_44 = arith.constant 0 : index
    %196 = vector.load %arg7[%c128, %c0_44] : memref<264x128xf32, #tpu.memory_space<vmem>>, vector<128x128xf32>
    %c256 = arith.constant 256 : index
    %c0_45 = arith.constant 0 : index
    %197 = vector.load %arg7[%c256, %c0_45] : memref<264x128xf32, #tpu.memory_space<vmem>>, vector<1x128xf32>
    %c257 = arith.constant 257 : index
    %c0_46 = arith.constant 0 : index
    %198 = vector.load %arg7[%c257, %c0_46] : memref<264x128xf32, #tpu.memory_space<vmem>>, vector<1x128xf32>
    %c0_47 = arith.constant 0 : index
    %c0_48 = arith.constant 0 : index
    %199 = vector.load %arg0[%c0_47, %c0_48] : memref<1x32xf32, #tpu.memory_space<vmem>>, vector<1x32xf32>
    %cst_49 = arith.constant dense<0.000000e+00> : vector<1x128xf32>
    %200 = tpu.matmul %199, %194, %cst_49 {dimension_numbers = #tpu.dot_dimension_numbers<[1], [0], [0], [1], [0, 0, 1, 1], [], []>} : vector<1x32xf32>, vector<32x128xf32>, vector<1x128xf32> -> vector<1x128xf32>
    %c0_50 = arith.constant 0 : index
    %c0_51 = arith.constant 0 : index
    %201 = vector.load %arg4[%c0_50, %c0_51] : memref<1x94xf32, #tpu.memory_space<vmem>>, vector<1x94xf32>
    %cst_52 = arith.constant dense<0.000000e+00> : vector<1x128xf32>
    %202 = tpu.matmul %201, %195, %cst_52 {dimension_numbers = #tpu.dot_dimension_numbers<[1], [0], [0], [1], [0, 0, 1, 1], [], []>} : vector<1x94xf32>, vector<94x128xf32>, vector<1x128xf32> -> vector<1x128xf32>
    %203 = arith.addf %200, %202 : vector<1x128xf32>
    %204 = arith.addf %203, %197 : vector<1x128xf32>
    %cst_53 = arith.constant 0.000000e+00 : f32
    %205 = vector.broadcast %cst_53 : f32 to vector<1x128xf32>
    %206 = arith.maximumf %204, %205 : vector<1x128xf32>
    %cst_54 = arith.constant dense<0.000000e+00> : vector<1x128xf32>
    %207 = tpu.matmul %206, %196, %cst_54 {dimension_numbers = #tpu.dot_dimension_numbers<[1], [0], [0], [1], [0, 0, 1, 1], [], []>} : vector<1x128xf32>, vector<128x128xf32>, vector<1x128xf32> -> vector<1x128xf32>
    %208 = arith.addf %207, %198 : vector<1x128xf32>
    %209 = arith.negf %208 : vector<1x128xf32>
    %210 = math.exp %209 : vector<1x128xf32>
    %cst_55 = arith.constant 1.000000e+00 : f32
    %211 = vector.broadcast %cst_55 : f32 to vector<1x128xf32>
    %212 = arith.addf %211, %210 : vector<1x128xf32>
    %213 = arith.divf %211, %212 : vector<1x128xf32>
    %214 = vector.shape_cast %213 : vector<1x128xf32> to vector<1x128xf32>
    %215 = vector.broadcast %214 : vector<1x128xf32> to vector<8x128xf32>
    %c0_56 = arith.constant 0 : index
    %c0_57 = arith.constant 0 : index
    %216 = vector.load %arg9[%c0_56, %c0_57] : memref<8x128xf32, #tpu.memory_space<vmem>>, vector<8x128xf32>
    tpu.vector_store %arg9[%c0_56, %c0_57], %215 {strides = array<i32>} : memref<8x128xf32, #tpu.memory_space<vmem>>, vector<8x128xf32>,
    return
  }
}

</mosaic_0001>

<bundles_post_ra>
// kernel: cpci_action_forward.1
= control target key start
LH: loop header
LB: loop body
LE: loop exit
PB: predicated region body
PF: predicated region fallthrough
CT: control target
= control target key end

     0   :  { %15 = vsyncpa [#allocation3], 0  ;;  %s2448_s0 = inlined_call_operand.vmem [shape: f32[1,32], index: 0, kind: input, shape index: {}]   ;;  %s2449_s1 = inlined_call_operand.vmem [shape: f32[8,4], index: 1, kind: input, shape index: {}]   ;;  %s2450_s2 = inlined_call_operand.vmem [shape: f32[8,32], index: 2, kind: input, shape index: {}]   ;;  %s2451_s3 = inlined_call_operand.vmem [shape: f32[8,32], index: 3, kind: input, shape index: {}]   ;;  %s2452_s4 = inlined_call_operand.vmem [shape: f32[1,94], index: 4, kind: input, shape index: {}]   ;;  %s2453_s5 = inlined_call_operand.hbm [shape: f32[42,96], index: 5, kind: input, shape index: {}]   ;;  %s2454_s6 = inlined_call_operand.hbm [shape: f32[104,128], index: 6, kind: input, shape index: {}]   ;;  %s2455_s7 = inlined_call_operand.hbm [shape: f32[264,128], index: 7, kind: input, shape index: {}]   ;;  %s2456_s8 = inlined_call_operand.vmem [shape: f32[16,128], index: 8, kind: output, shape index: {0}]   ;;  %s2457_s9 = inlined_call_operand.vmem [shape: f32[8,128], index: 9, kind: output, shape index: {1}]  }
   0x1   :  { %16 = vsyncpa [#allocation5], 0  ;;  %s2094_s30 = smov [#allocation4]   ;;  %s2095_s11 = smov [#allocation2]  }
   0x2   :  { %s44_s10 = sshll.u32 %s2094_s30, 4  ;;  %s32_s12 = sshll.u32 %s2095_s11, 4  ;;  %s45_s10 = int_to_ptr.vmem [resolvable:$true] %s44_s10  ;;  %s2157_s12 = int_to_ptr.vmem [resolvable:$true] %s32_s12 }
   0x3   :  { %s2024_s15 = scalar_lea.hbm %s2454_s6, 1664 }
   0x4   :  { %p2025_p0 = scmp.ne.s32.totalorder %s2454_s6, %s2024_s15  ;;  %p2028_p1 = scmp.lt.u32.totalorder %s2024_s15, %s2454_s6 }
   0x6   :  { %p2030_p2 = pnand %p2028_p1, %p2025_p0 }
   0x8   :  { %2033 = shalt.err (!%p2030_p2)
}
   0x9   :  { %s2034_s20 = scalar_lea.vmem %s45_s10, 1664  ;;  %p2039_p4 = scmp.lt.s32.totalorder %s45_s10, %s45_s10 }
   0xa   :  { %p2035_p3 = scmp.ne.s32.totalorder %s45_s10, %s2034_s20  ;;  %p2040_p5 = scmp.lt.s32.totalorder %s2034_s20, %s2034_s20 }
   0xc   :  { %p2041_p6 = por %p2040_p5, %p2039_p4 }
   0xe   :  { %p2042_p7 = pnand %p2041_p6, %p2035_p3 }
  0x10   :  { %2045 = shalt.err (!%p2042_p7)
}
  0x11   :  { %s2096_s21 = smov 128   ;;  %s2097_s22 = smov 8  }
  0x12   :  { %50 = dma.hbm_to_vmem [thread:$0]  %s2454_s6, 1664, %s45_s10, [#allocation5], %s2096_s21, %s2096_s21, %s2097_s22  }
  0x13   :  { %s2046_s27 = scalar_lea.hbm %s2453_s5, 768 }
  0x14   :  { %p2047_p8 = scmp.ne.s32.totalorder %s2453_s5, %s2046_s27  ;;  %p2050_p9 = scmp.lt.u32.totalorder %s2046_s27, %s2453_s5 }
  0x16   :  { %p2052_p10 = pnand %p2050_p9, %p2047_p8 }
  0x18   :  { %2055 = shalt.err (!%p2052_p10)
}
  0x19   :  { %s2056_s13 = scalar_lea.vmem %s2157_s12, 768  ;;  %p2061_p12 = scmp.lt.s32.totalorder %s2157_s12, %s2157_s12 }
  0x1a   :  { %p2057_p11 = scmp.ne.s32.totalorder %s2157_s12, %s2056_s13  ;;  %p2062_p13 = scmp.lt.s32.totalorder %s2056_s13, %s2056_s13 }
  0x1c   :  { %p2063_p0 = por %p2062_p13, %p2061_p12 }
  0x1e   :  { %p2064_p1 = pnand %p2063_p0, %p2057_p11 }
  0x20   :  { %2067 = shalt.err (!%p2064_p1)
}
  0x21   :  { %38 = dma.hbm_to_vmem [thread:$0]  %s2453_s5, 768, %s2157_s12, [#allocation3], %s2096_s21, %s2096_s21, %s2097_s22  }
  0x22   :  { %s2098_s14 = smov [#allocation6]   ;;  %s2068_s18 = scalar_lea.hbm %s2455_s7, 4224 }
  0x23   :  { %s56_s15 = sshll.u32 %s2098_s14, 4  ;;  %p2069_p2 = scmp.ne.s32.totalorder %s2455_s7, %s2068_s18  ;;  %s57_s15 = int_to_ptr.vmem [resolvable:$true] %s56_s15 }
  0x24   :  { %p2072_p3 = scmp.lt.u32.totalorder %s2068_s18, %s2455_s7 }
  0x26   :  { %p2074_p4 = pnand %p2072_p3, %p2069_p2 }
  0x28   :  { %2077 = shalt.err (!%p2074_p4)
}
  0x29   :  { %s2078_s25 = scalar_lea.vmem %s57_s15, 4224  ;;  %p2083_p6 = scmp.lt.s32.totalorder %s57_s15, %s57_s15 }
  0x2a   :  { %p2079_p5 = scmp.ne.s32.totalorder %s57_s15, %s2078_s25  ;;  %p2084_p7 = scmp.lt.s32.totalorder %s2078_s25, %s2078_s25 }
  0x2c   :  { %p2085_p8 = por %p2084_p7, %p2083_p6 }
  0x2e   :  { %p2086_p9 = pnand %p2085_p8, %p2079_p5 }
  0x30   :  { %2089 = shalt.err (!%p2086_p9)
}
  0x31   :  { %62 = dma.hbm_to_vmem [thread:$0]  %s2455_s7, 4224, %s57_s15, [#allocation5], %s2096_s21, %s2096_s21, %s2097_s22  }
  0x32   :  { %2090 = dma.done.wait [#allocation3], 768  }
  0x33   :  { %2091 = vsyncadd [#allocation3], 4294966528 }
  0x34   :  { %2092 = dma.done.wait [#allocation5], 5888  }
  0x35   :  { %2093 = vsyncadd [#allocation5], 4294961408  ;;  %v2099_v0 = vmov 0.0|0.0   ;;  %v2100_v1 = vmov 0.0   ;;  %vm2101_vm0 = vmmov 0   ;;  %vm88_vm1 = vcmask 1043456  }
  0x36   :  { %1848 = vmatprep.subr.bf16.mxu1 %v2099_v0  ;;  %1660 = vmatprep.subr.mxu0 %v2100_v1  ;;  %v73_v2 = vld [vmem:[#allocation2 + $0x8] sm:$0xff]  ;;  %v74_v3 = vld [vmem:[#allocation2 + $0x10] sm:$0xff]  ;;  %v75_v4 = vld [vmem:[#allocation2 + $0x18] sm:$0xff]  ;;  %vm84_vm2 = vcmask 31744   ;;  %vm163_vm3 = vcmask 261120   ;;  %s2102_s26 = smov 64   ;;  %v259_v30 = vlaneseq }
  0x37   :  { %1662 = vmatprep.mubr.msk.f32.mxu0 %vm2101_vm0, %v2100_v1  ;;  %1673 = vmatprep.mubr.msk.f32.mxu1 %vm2101_vm0, %v2100_v1  ;;  %v2215_v5 = vpack.c.bf16 %v74_v3, %v73_v2  ;;  %v76_v6 = vld [vmem:[#allocation2 + $0x20] sm:$0xff]  ;;  %v2244_v13 = vld [vmem:[#allocation2 + $0x29] sm:$0x1]  ;;  %v1545_v17 = vld [vmem:[#allocation2 + $0x28] ss:$0 sm:$0xff]  ;;  %s2104_s27 = smov 32  }
  0x38   :  { %v72_v7 = vld [vmem:[#allocation2] sm:$0xf]  ;;  %v2222_v9 = vpack.c.bf16 %v76_v6, %v75_v4  ;;  %v2103_v28 = vmov 1966171168   ;;  %v2253_v32 = vshrl.u32 %v259_v30, 7  ;;  %s2105_s28 = smov 96  }
  0x39   :  { %v79_v8 = vld [vmem:[%s2449_s1] sm:$0xff]  ;;  %1661 = vmatpush3.msk.msra.mxu0 %vm88_vm1, %v72_v7  ;;  %1850 = vmatpush3.bf16.msra.mxu1 %v2215_v5  ;;  %v257_v29 = vunpack.c.l.s4 %v2103_v28  ;;  %vm1064_vm4 = vcmask 1040384   ;;  %vm1066_vm5 = vcmask 1041408   ;;  %vm1068_vm6 = vcmask 1042432  }
  0x3a   :  { %1663 = vmatmul.mubr.msk.f32.vlgmr.msra.gmra.mrb[0].mxu0 %vm84_vm2, %v79_v8  ;;  %1851 = vmatprep.subr.bf16.mxu1 %v2099_v0  ;;  %v162_v10 = vld [vmem:[%s2448_s0] sm:$0x1]  ;;  %v277_v37 = vsub.s32 0, %v2253_v32  ;;  %vm1071_vm7 = vcmask 1044480   ;;  %vm1073_vm8 = vcmask 1045504   ;;  %vm1075_vm9 = vcmask 1046528  }
  0x3b   :  { %1866 = vmatprep.subr.bf16.mxu0 %v2099_v0  ;;  %1706 = vmatprep.mubr.msk.f32.mxu0 %vm2101_vm0, %v2100_v1  ;;  %v258_v31 = vunpack.c.0.s8 %v257_v29  ;;  %vm2106_vm10 = vmmov 1   ;;  %vm1302_vm12 = vcmask 769024  }
  0x3c   :  { %1868 = vmatpush3.bf16.msra.mxu0 %v2215_v5  ;;  %vm1927_vm11 = vmpackc.low %vm1073_vm8, %vm2106_vm10 }
  0x3d   :  { %1869 = vmatprep.subr.bf16.mxu0 %v2099_v0  ;;  %1853 = vmatpush3.bf16.msra.mxu1 %v2222_v9  ;;  %v261_v33 = vsub.s32 %v258_v31, %v2253_v32 }
  0x3e   :  { %1854 = vmatprep.subr.bf16.mxu1 %v2099_v0 }
  0x40   :  { %1871 = vmatpush3.bf16.msra.mxu0 %v2222_v9  ;;  %1674 = vmatmul.mubr.msk.f32.vlgmr.msra.gmra.mrb[0].mxu1 %vm163_vm3, %v162_v10 }
  0x41   :  { %1878 = vmatprep.subr.bf16.mxu0 %v2099_v0  ;;  %1856 = vmatpush3.bf16.msra.mxu1 %v2215_v5 }
  0x42   :  { %1684 = vmatprep.mubr.msk.f32.mxu1 %vm2101_vm0, %v2100_v1  ;;  %1857 = vmatprep.subr.bf16.mxu1 %v2099_v0 }
  0x45   :  { %1859 = vmatpush3.bf16.msra.mxu1 %v2222_v9 }
  0x46   :  { %1860 = vmatprep.subr.bf16.mxu1 %v2099_v0 }
 0x10d   :  { %v158_v11 = vpop.f32.mrb[0].mxu0 }
 0x10e   :  { %v1664_v12 = vpop.f32.mrb[1].mxu0  ;;  %v2248_v18 = vadd.f32 %v1545_v17, %v158_v11 }
 0x113   :  { %v233_v14 = vpop.f32.mrb[0].mxu1 }
 0x114   :  { %v234_v15 = vadd.f32 %v233_v14, %v2244_v13  ;;  %v1675_v16 = vpop.f32.mrb[1].mxu1 }
 0x116   :  { %245 = vrot.lane.b32.xlu0 %v234_v15, %s2102_s26  ;;  %v237_v19 = vadd.f32 %v234_v15, %v2248_v18 }
 0x118   :  { %v1549_v20 = vmul.f32 -1.442695, %v237_v19 }
 0x11a   :  { %1972 = vpow2.f32 %v1549_v20 }
 0x124   :  { %v1973_v21 = vpop.eup %1972 }
 0x125   :  { %v241_v22 = vadd.f32 1.0, %v1973_v21 }
 0x127   :  { %1974 = vrcp.f32 %v241_v22 }
 0x131   :  { %v1975_v23 = vpop.eup %1974 }
 0x188   :  { %v246_v24 = vpop.permute.xlu0 %245 }
 0x189   :  { %v248_v25 = vmul.f32 %v1975_v23, %v246_v24 }
 0x18b   :  { %250 = vrot.lane.b32.xlu0 %v248_v25, %s2102_s26 }
 0x1fd   :  { %v251_v26 = vpop.permute.xlu0 %250 }
 0x1fe   :  { %v253_v27 = vadd.f32 %v251_v26, %v2248_v18 }
 0x200   :  { %1976 = vtanh.f32 %v253_v27 }
 0x20a   :  { %v1977_v34 = vpop.eup %1976 }
 0x20b   :  { %v262_v35 = vrot.slane %v1977_v34, %v261_v33 }
 0x20d   :  { %v269_v36 = vrot.slane %v262_v35, %v261_v33 }
 0x20f   :  { %270 = vrot.lane.b32.xlu1 %v269_v36, %s2102_s26 }
 0x281   :  { %v271_v38 = vpop.permute.xlu1 %270 }
 0x282   :  { %v273_v39 = vsub.f32 %v162_v10, %v271_v38 }
 0x284   :  { %v278_v40 = vrot.slane %v273_v39, %v277_v37 }
 0x286   :  { %279 = vrot.lane.b32.xlu1 %v278_v40, %s2104_s27 }
 0x2f8   :  { %v280_v41 = vpop.permute.xlu1 %279 }
 0x2f9   :  { %v282_v42 = vmul.f32 %v1975_v23, %v280_v41 }
 0x2fb   :  { %284 = vrot.lane.b32.xlu0 %v282_v42, %s2104_s27 }
 0x36d   :  { %v285_v43 = vpop.permute.xlu0 %284 }
 0x36e   :  { %v2262_v44 = vadd.f32 %v1977_v34, %v285_v43 }
 0x370   :  { %289 = vrot.lane.b32.xlu1 %v2262_v44, %s2102_s26 }
 0x3e2   :  { %v290_v45 = vpop.permute.xlu1 %289 }
 0x3e3   :  { %1685 = vmatmul.mubr.msk.f32.vlgmr.msra.gmra.mrb[2].mxu1 %vm163_vm3, %v290_v45 }
 0x3e4   :  { %1862 = vmatpush3.bf16.msra.mxu1 %v2215_v5  ;;  %1695 = vmatprep.mubr.msk.f32.mxu1 %vm2101_vm0, %v2100_v1 }
 0x3e5   :  { %1863 = vmatprep.subr.bf16.mxu1 %v2099_v0 }
 0x3e8   :  { %1865 = vmatpush3.bf16.msra.mxu1 %v2222_v9 }
 0x3e9   :  { %1872 = vmatprep.subr.bf16.mxu1 %v2099_v0 }
 0x4b6   :  { %v359_v46 = vpop.f32.mrb[2].mxu1 }
 0x4b7   :  { %v360_v47 = vadd.f32 %v359_v46, %v2244_v13  ;;  %v1686_v48 = vpop.f32.mrb[3].mxu1 }
 0x4b9   :  { %v364_v49 = vrot.slane %v360_v47, 7 }
 0x4bb   :  { %373 = vrot.lane.b32.xlu0 %v364_v49, %s2102_s26  ;;  %v366_v50 = vadd.f32 %v364_v49, %v2248_v18 }
 0x4bd   :  { %v1551_v51 = vmul.f32 -1.442695, %v366_v50 }
 0x4bf   :  { %1978 = vpow2.f32 %v1551_v51 }
 0x4c9   :  { %v1979_v52 = vpop.eup %1978 }
 0x4ca   :  { %v370_v53 = vadd.f32 1.0, %v1979_v52 }
 0x4cc   :  { %1980 = vrcp.f32 %v370_v53 }
 0x4d6   :  { %v1981_v54 = vpop.eup %1980 }
 0x52d   :  { %v374_v55 = vpop.permute.xlu0 %373 }
 0x52e   :  { %v376_v56 = vmul.f32 %v1981_v54, %v374_v55 }
 0x530   :  { %378 = vrot.lane.b32.xlu1 %v376_v56, %s2102_s26 }
 0x5a2   :  { %v379_v57 = vpop.permute.xlu1 %378 }
 0x5a3   :  { %v381_v58 = vadd.f32 %v379_v57, %v2248_v18 }
 0x5a5   :  { %1982 = vtanh.f32 %v381_v58 }
 0x5af   :  { %v1983_v59 = vpop.eup %1982 }
 0x5b0   :  { %v384_v60 = vrot.slane %v1983_v59, 1 }
 0x5b2   :  { %v386_v61 = vsub.f32 %v2262_v44, %v384_v60 }
 0x5b4   :  { %v388_v62 = vrot.slane %v386_v61, 7 }
 0x5b6   :  { %389 = vrot.lane.b32.xlu0 %v388_v62, %s2105_s28 }
 0x628   :  { %v390_v63 = vpop.permute.xlu0 %389 }
 0x629   :  { %v392_v2 = vmul.f32 %v1981_v54, %v390_v63 }
 0x62b   :  { %394 = vrot.lane.b32.xlu1 %v392_v2, %s2104_s27 }
 0x69d   :  { %v395_v3 = vpop.permute.xlu1 %394 }
 0x69e   :  { %v2281_v4 = vadd.f32 %v1983_v59, %v395_v3 }
 0x6a0   :  { %v399_v6 = vrot.slane %v2281_v4, 1 }
 0x6a2   :  { %400 = vrot.lane.b32.xlu0 %v399_v6, %s2102_s26 }
 0x714   :  { %v401_v7 = vpop.permute.xlu0 %400 }
 0x715   :  { %1696 = vmatmul.mubr.msk.f32.vlgmr.msra.gmra.mrb[4].mxu1 %vm163_vm3, %v401_v7 }
 0x716   :  { %1874 = vmatpush3.bf16.msra.mxu1 %v2215_v5  ;;  %1717 = vmatprep.mubr.msk.f32.mxu1 %vm2101_vm0, %v2100_v1 }
 0x717   :  { %1875 = vmatprep.subr.bf16.mxu1 %v2099_v0 }
 0x71a   :  { %1877 = vmatpush3.bf16.msra.mxu1 %v2222_v9 }
 0x71b   :  { %1884 = vmatprep.subr.bf16.mxu1 %v2099_v0 }
 0x7e8   :  { %v470_v8 = vpop.f32.mrb[4].mxu1 }
 0x7e9   :  { %v471_v10 = vadd.f32 %v470_v8, %v2244_v13  ;;  %v1697_v11 = vpop.f32.mrb[5].mxu1 }
 0x7eb   :  { %v475_v12 = vrot.slane %v471_v10, 6 }
 0x7ed   :  { %484 = vrot.lane.b32.xlu1 %v475_v12, %s2102_s26  ;;  %v477_v14 = vadd.f32 %v475_v12, %v2248_v18 }
 0x7ef   :  { %v1553_v15 = vmul.f32 -1.442695, %v477_v14 }
 0x7f1   :  { %1984 = vpow2.f32 %v1553_v15 }
 0x7fb   :  { %v1985_v16 = vpop.eup %1984 }
 0x7fc   :  { %v481_v17 = vadd.f32 1.0, %v1985_v16 }
 0x7fe   :  { %1986 = vrcp.f32 %v481_v17 }
 0x808   :  { %v1987_v19 = vpop.eup %1986 }
 0x85f   :  { %v485_v20 = vpop.permute.xlu1 %484 }
 0x860   :  { %v487_v21 = vmul.f32 %v1987_v19, %v485_v20 }
 0x862   :  { %489 = vrot.lane.b32.xlu0 %v487_v21, %s2102_s26 }
 0x8d4   :  { %v490_v22 = vpop.permute.xlu0 %489 }
 0x8d5   :  { %v492_v23 = vadd.f32 %v490_v22, %v2248_v18 }
 0x8d7   :  { %1988 = vtanh.f32 %v492_v23 }
 0x8e1   :  { %v1989_v24 = vpop.eup %1988 }
 0x8e2   :  { %v495_v25 = vrot.slane %v1989_v24, 1 }
 0x8e4   :  { %v497_v26 = vsub.f32 %v2281_v4, %v495_v25 }
 0x8e6   :  { %v499_v27 = vrot.slane %v497_v26, 7 }
 0x8e8   :  { %500 = vrot.lane.b32.xlu1 %v499_v27, %s2105_s28 }
 0x95a   :  { %v501_v28 = vpop.permute.xlu1 %500 }
 0x95b   :  { %v503_v29 = vmul.f32 %v1987_v19, %v501_v28 }
 0x95d   :  { %505 = vrot.lane.b32.xlu0 %v503_v29, %s2104_s27 }
 0x9cf   :  { %v506_v30 = vpop.permute.xlu0 %505 }
 0x9d0   :  { %v2300_v31 = vadd.f32 %v1989_v24, %v506_v30 }
 0x9d2   :  { %v510_v33 = vrot.slane %v2300_v31, 2 }
 0x9d4   :  { %511 = vrot.lane.b32.xlu1 %v510_v33, %s2102_s26 }
 0xa46   :  { %v512_v34 = vpop.permute.xlu1 %511 }
 0xa47   :  { %1707 = vmatmul.mubr.msk.f32.vlgmr.msra.gmra.mrb[2].mxu0 %vm163_vm3, %v512_v34 }
 0xa48   :  { %1880 = vmatpush3.bf16.msra.mxu0 %v2215_v5  ;;  %1728 = vmatprep.mubr.msk.f32.mxu0 %vm2101_vm0, %v2100_v1 }
 0xa49   :  { %1881 = vmatprep.subr.bf16.mxu0 %v2099_v0 }
 0xa4c   :  { %1883 = vmatpush3.bf16.msra.mxu0 %v2222_v9 }
 0xa4d   :  { %1890 = vmatprep.subr.bf16.mxu0 %v2099_v0 }
 0xb1a   :  { %v581_v35 = vpop.f32.mrb[2].mxu0 }
 0xb1b   :  { %v582_v36 = vadd.f32 %v581_v35, %v2244_v13  ;;  %v1708_v38 = vpop.f32.mrb[3].mxu0 }
 0xb1d   :  { %v586_v39 = vrot.slane %v582_v36, 5 }
 0xb1f   :  { %595 = vrot.lane.b32.xlu0 %v586_v39, %s2102_s26  ;;  %v588_v40 = vadd.f32 %v586_v39, %v2248_v18 }
 0xb21   :  { %v1555_v41 = vmul.f32 -1.442695, %v588_v40 }
 0xb23   :  { %1990 = vpow2.f32 %v1555_v41 }
 0xb2d   :  { %v1991_v42 = vpop.eup %1990 }
 0xb2e   :  { %v592_v43 = vadd.f32 1.0, %v1991_v42 }
 0xb30   :  { %1992 = vrcp.f32 %v592_v43 }
 0xb3a   :  { %v1993_v45 = vpop.eup %1992 }
 0xb91   :  { %v596_v46 = vpop.permute.xlu0 %595 }
 0xb92   :  { %v598_v47 = vmul.f32 %v1993_v45, %v596_v46 }
 0xb94   :  { %600 = vrot.lane.b32.xlu1 %v598_v47, %s2102_s26 }
 0xc06   :  { %v601_v48 = vpop.permute.xlu1 %600 }
 0xc07   :  { %v603_v49 = vadd.f32 %v601_v48, %v2248_v18 }
 0xc09   :  { %1994 = vtanh.f32 %v603_v49 }
 0xc13   :  { %v1995_v50 = vpop.eup %1994 }
 0xc14   :  { %v606_v51 = vrot.slane %v1995_v50, 1 }
 0xc16   :  { %v608_v52 = vsub.f32 %v2300_v31, %v606_v51 }
 0xc18   :  { %v610_v53 = vrot.slane %v608_v52, 7 }
 0xc1a   :  { %611 = vrot.lane.b32.xlu0 %v610_v53, %s2105_s28 }
 0xc8c   :  { %v612_v54 = vpop.permute.xlu0 %611 }
 0xc8d   :  { %v614_v55 = vmul.f32 %v1993_v45, %v612_v54 }
 0xc8f   :  { %616 = vrot.lane.b32.xlu1 %v614_v55, %s2104_s27 }
 0xd01   :  { %v617_v56 = vpop.permute.xlu1 %616 }
 0xd02   :  { %v2319_v57 = vadd.f32 %v1995_v50, %v617_v56 }
 0xd04   :  { %v621_v58 = vrot.slane %v2319_v57, 3 }
 0xd06   :  { %622 = vrot.lane.b32.xlu0 %v621_v58, %s2102_s26 }
 0xd78   :  { %v623_v59 = vpop.permute.xlu0 %622 }
 0xd79   :  { %1718 = vmatmul.mubr.msk.f32.vlgmr.msra.gmra.mrb[6].mxu1 %vm163_vm3, %v623_v59 }
 0xd7a   :  { %1886 = vmatpush3.bf16.msra.mxu1 %v2215_v5  ;;  %1739 = vmatprep.mubr.msk.f32.mxu1 %vm2101_vm0, %v2100_v1 }
 0xd7b   :  { %1887 = vmatprep.subr.bf16.mxu1 %v2099_v0 }
 0xd7e   :  { %1889 = vmatpush3.bf16.msra.mxu1 %v2222_v9 }
 0xd7f   :  { %1896 = vmatprep.subr.bf16.mxu1 %v2099_v0 }
 0xe4c   :  { %v692_v60 = vpop.f32.mrb[6].mxu1 }
 0xe4d   :  { %v693_v61 = vadd.f32 %v692_v60, %v2244_v13  ;;  %v1719_v62 = vpop.f32.mrb[7].mxu1 }
 0xe4f   :  { %v697_v63 = vrot.slane %v693_v61, 4 }
 0xe51   :  { %706 = vrot.lane.b32.xlu1 %v697_v63, %s2102_s26  ;;  %v699_v2 = vadd.f32 %v697_v63, %v2248_v18 }
 0xe53   :  { %v1557_v3 = vmul.f32 -1.442695, %v699_v2 }
 0xe55   :  { %1996 = vpow2.f32 %v1557_v3 }
 0xe5f   :  { %v1997_v6 = vpop.eup %1996 }
 0xe60   :  { %v703_v7 = vadd.f32 1.0, %v1997_v6 }
 0xe62   :  { %1998 = vrcp.f32 %v703_v7 }
 0xe6c   :  { %v1999_v8 = vpop.eup %1998 }
 0xec3   :  { %v707_v10 = vpop.permute.xlu1 %706 }
 0xec4   :  { %v709_v11 = vmul.f32 %v1999_v8, %v707_v10 }
 0xec6   :  { %711 = vrot.lane.b32.xlu0 %v709_v11, %s2102_s26 }
 0xf38   :  { %v712_v12 = vpop.permute.xlu0 %711 }
 0xf39   :  { %v714_v14 = vadd.f32 %v712_v12, %v2248_v18 }
 0xf3b   :  { %2000 = vtanh.f32 %v714_v14 }
 0xf45   :  { %v2001_v15 = vpop.eup %2000 }
 0xf46   :  { %v717_v16 = vrot.slane %v2001_v15, 1 }
 0xf48   :  { %v719_v17 = vsub.f32 %v2319_v57, %v717_v16 }
 0xf4a   :  { %v721_v19 = vrot.slane %v719_v17, 7 }
 0xf4c   :  { %722 = vrot.lane.b32.xlu1 %v721_v19, %s2105_s28 }
 0xfbe   :  { %v723_v20 = vpop.permute.xlu1 %722 }
 0xfbf   :  { %v725_v21 = vmul.f32 %v1999_v8, %v723_v20 }
 0xfc1   :  { %727 = vrot.lane.b32.xlu0 %v725_v21, %s2104_s27 }
0x1033   :  { %v728_v22 = vpop.permute.xlu0 %727 }
0x1034   :  { %v2338_v23 = vadd.f32 %v2001_v15, %v728_v22 }
0x1036   :  { %v732_v24 = vrot.slane %v2338_v23, 4 }
0x1038   :  { %733 = vrot.lane.b32.xlu1 %v732_v24, %s2102_s26 }
0x10aa   :  { %v734_v25 = vpop.permute.xlu1 %733 }
0x10ab   :  { %1729 = vmatmul.mubr.msk.f32.vlgmr.msra.gmra.mrb[4].mxu0 %vm163_vm3, %v734_v25 }
0x10ac   :  { %1892 = vmatpush3.bf16.msra.mxu0 %v2215_v5  ;;  %1750 = vmatprep.mubr.msk.f32.mxu0 %vm2101_vm0, %v2100_v1 }
0x10ad   :  { %1893 = vmatprep.subr.bf16.mxu0 %v2099_v0 }
0x10b0   :  { %1895 = vmatpush3.bf16.msra.mxu0 %v2222_v9 }
0x117e   :  { %v803_v26 = vpop.f32.mrb[4].mxu0 }
0x117f   :  { %v804_v27 = vadd.f32 %v803_v26, %v2244_v13  ;;  %v1730_v28 = vpop.f32.mrb[5].mxu0 }
0x1181   :  { %v808_v29 = vrot.slane %v804_v27, 3 }
0x1183   :  { %817 = vrot.lane.b32.xlu0 %v808_v29, %s2102_s26  ;;  %v810_v30 = vadd.f32 %v808_v29, %v2248_v18 }
0x1185   :  { %v1559_v33 = vmul.f32 -1.442695, %v810_v30 }
0x1187   :  { %2002 = vpow2.f32 %v1559_v33 }
0x1191   :  { %v2003_v34 = vpop.eup %2002 }
0x1192   :  { %v814_v5 = vadd.f32 1.0, %v2003_v34 }
0x1194   :  { %2004 = vrcp.f32 %v814_v5 }
0x119e   :  { %v2005_v35 = vpop.eup %2004 }
0x11f5   :  { %v818_v36 = vpop.permute.xlu0 %817 }
0x11f6   :  { %v820_v38 = vmul.f32 %v2005_v35, %v818_v36  ;;  %v1077_v36 = vld [vmem:[#allocation4] sm:$0xff] }
0x11f8   :  { %822 = vrot.lane.b32.xlu1 %v820_v38, %s2102_s26  ;;  %v1078_v38 = vld [vmem:[#allocation4 + $0x8] sm:$0xff] }
0x126a   :  { %v823_v9 = vpop.permute.xlu1 %822 }
0x126b   :  { %v825_v39 = vadd.f32 %v823_v9, %v2248_v18  ;;  %v1081_v9 = vld [vmem:[#allocation4 + $0x20] sm:$0xff] }
0x126d   :  { %2006 = vtanh.f32 %v825_v39  ;;  %v1902_v39 = vpack.c.bf16 %v1078_v38, %v1077_v36  ;;  %v1287_v36 = vld [vmem:[#allocation6 + $0xa8] sm:$0xff] }
0x126f   :  { %1903 = vmatprep.subr.bf16.mxu0 %v1902_v39 }
0x1277   :  { %v2007_v40 = vpop.eup %2006 }
0x1278   :  { %v828_v41 = vrot.slane %v2007_v40, 1 }
0x127a   :  { %v830_v42 = vsub.f32 %v2338_v23, %v828_v41  ;;  %v1079_v41 = vld [vmem:[#allocation4 + $0x10] sm:$0xff] }
0x127c   :  { %v832_v43 = vrot.slane %v830_v42, 7  ;;  %v1080_v42 = vld [vmem:[#allocation4 + $0x18] sm:$0xff] }
0x127e   :  { %833 = vrot.lane.b32.xlu0 %v832_v43, %s2105_s28 }
0x12f0   :  { %v834_v45 = vpop.permute.xlu0 %833 }
0x12f1   :  { %v836_v46 = vmul.f32 %v2005_v35, %v834_v45  ;;  %v1906_v45 = vpack.c.bf16 %v1080_v42, %v1079_v41  ;;  %v1291_v42 = vld [vmem:[#allocation6 + $0xc8] sm:$0xff] }
0x12f3   :  { %838 = vrot.lane.b32.xlu1 %v836_v46, %s2104_s27  ;;  %v1083_v46 = vld [vmem:[#allocation4 + $0x30] sm:$0xff] }
0x1365   :  { %v839_v47 = vpop.permute.xlu1 %838 }
0x1366   :  { %v2356_v48 = vadd.f32 %v2007_v40, %v839_v47  ;;  %v1082_v40 = vld [vmem:[#allocation4 + $0x28] sm:$0xff]  ;;  %v1084_v47 = vld [vmem:[#allocation4 + $0x38] sm:$0xff] }
0x1367   :  { %v1897_v43 = vpack.c.bf16 %v1082_v40, %v1081_v9  ;;  %v1288_v9 = vld [vmem:[#allocation6 + $0xb0] sm:$0xff]  ;;  %v1290_v40 = vld [vmem:[#allocation6 + $0xc0] sm:$0xff] }
0x1368   :  { %v843_v49 = vrot.slane %v2356_v48, 5 }
0x136a   :  { %844 = vrot.lane.b32.xlu0 %v843_v49, %s2102_s26  ;;  %v1900_v49 = vpack.c.bf16 %v1084_v47, %v1083_v46  ;;  %v1293_v46 = vld [vmem:[#allocation6 + $0xd8] sm:$0xff] }
0x13dc   :  { %v845_v50 = vpop.permute.xlu0 %844 }
0x13dd   :  { %1740 = vmatmul.mubr.msk.f32.vlgmr.msra.gmra.mrb[8].mxu1 %vm163_vm3, %v845_v50 }
0x13de   :  { %1761 = vmatprep.mubr.msk.f32.mxu1 %vm2101_vm0, %v2100_v1  ;;  %1898 = vmatpush3.bf16.msra.mxu1 %v1897_v43  ;;  %v1948_v43 = vpack.c.bf16 %v1291_v42, %v1290_v40 }
0x13df   :  { %1899 = vmatprep.subr.bf16.mxu1 %v2099_v0 }
0x13e2   :  { %1901 = vmatpush3.bf16.msra.mxu1 %v1900_v49  ;;  %v1295_v49 = vld [vmem:[#allocation6 + $0xe8] sm:$0xff] }
0x13e3   :  { %1910 = vmatprep.subr.bf16.mxu1 %v2099_v0 }
0x14b0   :  { %v914_v51 = vpop.f32.mrb[8].mxu1 }
0x14b1   :  { %v915_v52 = vadd.f32 %v914_v51, %v2244_v13  ;;  %v1741_v53 = vpop.f32.mrb[9].mxu1 }
0x14b2   :  { %v1065_v53 = vsel %vm1064_vm4, %v2262_v44, %v2281_v4  ;;  %v1266_v44 = vld [vmem:[#allocation6] sm:$0xff]  ;;  %v1267_v4 = vld [vmem:[#allocation6 + $0x8] sm:$0xff] }
0x14b3   :  { %v919_v54 = vrot.slane %v915_v52, 2  ;;  %v1091_v52 = vld [vmem:[%s2451_s3] sm:$0xff] }
0x14b5   :  { %928 = vrot.lane.b32.xlu1 %v919_v54, %s2102_s26  ;;  %v921_v55 = vadd.f32 %v919_v54, %v2248_v18  ;;  %v1067_v54 = vsel %vm1066_vm5, %v1065_v53, %v2300_v31  ;;  %v1930_v31 = vpack.c.bf16 %v1267_v4, %v1266_v44  ;;  %v1296_v53 = vld [vmem:[#allocation6 + $0xf0] sm:$0xff]  ;;  %v1087_v4 = vld [vmem:[#allocation4 + $0x50] sm:$0xff] }
0x14b7   :  { %v1561_v56 = vmul.f32 -1.442695, %v921_v55  ;;  %v1069_v55 = vsel %vm1068_vm6, %v1067_v54, %v2319_v57  ;;  %v1268_v57 = vld [vmem:[#allocation6 + $0x10] sm:$0xff]  ;;  %v1297_v54 = vld [vmem:[#allocation6 + $0xf8] sm:$0xff] }
0x14b9   :  { %2008 = vpow2.f32 %v1561_v56  ;;  %v1070_v56 = vsel %vm88_vm1, %v1069_v55, %v2338_v23  ;;  %v1957_v55 = vpack.c.bf16 %v1297_v54, %v1296_v53 }
0x14c3   :  { %v2009_v58 = vpop.eup %2008 }
0x14c4   :  { %v925_v59 = vadd.f32 1.0, %v2009_v58 }
0x14c6   :  { %2010 = vrcp.f32 %v925_v59  ;;  %v1072_v59 = vsel %vm1071_vm7, %v1070_v56, %v2356_v48 }
0x14d0   :  { %v2011_v60 = vpop.eup %2010 }
0x1527   :  { %v929_v61 = vpop.permute.xlu1 %928 }
0x1528   :  { %v931_v62 = vmul.f32 %v2011_v60, %v929_v61 }
0x152a   :  { %933 = vrot.lane.b32.xlu0 %v931_v62, %s2102_s26 }
0x159c   :  { %v934_v63 = vpop.permute.xlu0 %933 }
0x159d   :  { %v936_v2 = vadd.f32 %v934_v63, %v2248_v18  ;;  %v1269_v63 = vld [vmem:[#allocation6 + $0x18] sm:$0xff] }
0x159e   :  { %v1933_v23 = vpack.c.bf16 %v1269_v63, %v1268_v57 }
0x159f   :  { %2012 = vtanh.f32 %v936_v2  ;;  %v1282_v2 = vld [vmem:[#allocation6 + $0x80] sm:$0xff] }
0x15a9   :  { %v2013_v3 = vpop.eup %2012 }
0x15aa   :  { %v939_v6 = vrot.slane %v2013_v3, 1 }
0x15ac   :  { %v941_v7 = vsub.f32 %v2356_v48, %v939_v6  ;;  %v1300_v48 = vld [vmem:[%s2448_s0] sm:$0x1] }
0x15ae   :  { %v943_v8 = vrot.slane %v941_v7, 7 }
0x15b0   :  { %944 = vrot.lane.b32.xlu1 %v943_v8, %s2105_s28  ;;  %v1270_v8 = vld [vmem:[#allocation6 + $0x20] sm:$0xff] }
0x1622   :  { %v945_v10 = vpop.permute.xlu1 %944 }
0x1623   :  { %v947_v11 = vmul.f32 %v2011_v60, %v945_v10  ;;  %v1271_v10 = vld [vmem:[#allocation6 + $0x28] sm:$0xff] }
0x1625   :  { %949 = vrot.lane.b32.xlu0 %v947_v11, %s2104_s27  ;;  %v1911_v11 = vpack.c.bf16 %v1271_v10, %v1270_v8 }
0x1697   :  { %v950_v12 = vpop.permute.xlu0 %949 }
0x1698   :  { %v2371_v14 = vadd.f32 %v2013_v3, %v950_v12  ;;  %v1283_v3 = vld [vmem:[#allocation6 + $0x88] sm:$0xff]  ;;  %v1272_v12 = vld [vmem:[#allocation6 + $0x30] sm:$0xff] }
0x1699   :  { %v1936_v6 = vpack.c.bf16 %v1283_v3, %v1282_v2 }
0x169a   :  { %v954_v15 = vrot.slane %v2371_v14, 6  ;;  %v1074_v61 = vsel %vm1073_vm8, %v1072_v59, %v2371_v14 }
0x169c   :  { %955 = vrot.lane.b32.xlu1 %v954_v15, %s2102_s26 }
0x170e   :  { %v956_v16 = vpop.permute.xlu1 %955 }
0x170f   :  { %1751 = vmatmul.mubr.msk.f32.vlgmr.msra.gmra.mrb[6].mxu0 %vm163_vm3, %v956_v16 }
0x1710   :  { %1905 = vmatpush3.bf16.msra.mxu0 %v1902_v39  ;;  %v1289_v39 = vld [vmem:[#allocation6 + $0xb8] sm:$0xff] }
0x1711   :  { %1907 = vmatprep.subr.bf16.mxu0 %v1906_v45  ;;  %v1945_v41 = vpack.c.bf16 %v1289_v39, %v1288_v9 }
0x1714   :  { %1909 = vmatpush3.bf16.msra.mxu0 %v1906_v45  ;;  %v1292_v45 = vld [vmem:[#allocation6 + $0xd0] sm:$0xff] }
0x1715   :  { %1929 = vmatprep.subr.bf16.mxu0 %v2099_v0  ;;  %v1951_v47 = vpack.c.bf16 %v1293_v46, %v1292_v45 }
0x17e2   :  { %v1025_v17 = vpop.f32.mrb[6].mxu0 }
0x17e3   :  { %v1026_v19 = vadd.f32 %v1025_v17, %v2244_v13  ;;  %v1752_v20 = vpop.f32.mrb[7].mxu0  ;;  %v1274_v17 = vld [vmem:[#allocation6 + $0x40] sm:$0xff] }
0x17e5   :  { %v1030_v21 = vrot.slane %v1026_v19, 1  ;;  %v1275_v19 = vld [vmem:[#allocation6 + $0x48] sm:$0xff] }
0x17e6   :  { %v1917_v20 = vpack.c.bf16 %v1275_v19, %v1274_v17  ;;  %v1299_v17 = vld [vmem:[#allocation6 + $0x101] sm:$0x1] }
0x17e7   :  { %1039 = vrot.lane.b32.xlu0 %v1030_v21, %s2102_s26  ;;  %v1032_v22 = vadd.f32 %v1030_v21, %v2248_v18  ;;  %v1276_v21 = vld [vmem:[#allocation6 + $0x50] sm:$0xff] }
0x17e9   :  { %v1563_v24 = vmul.f32 -1.442695, %v1032_v22  ;;  %v1277_v22 = vld [vmem:[#allocation6 + $0x58] sm:$0xff] }
0x17eb   :  { %2014 = vpow2.f32 %v1563_v24  ;;  %v1920_v24 = vpack.c.bf16 %v1277_v22, %v1276_v21 }
0x17f5   :  { %v2015_v25 = vpop.eup %2014 }
0x17f6   :  { %v1036_v26 = vadd.f32 1.0, %v2015_v25  ;;  %v1278_v25 = vld [vmem:[#allocation6 + $0x60] sm:$0xff] }
0x17f8   :  { %2016 = vrcp.f32 %v1036_v26  ;;  %v1279_v26 = vld [vmem:[#allocation6 + $0x68] sm:$0xff] }
0x1802   :  { %v2017_v27 = vpop.eup %2016 }
0x1859   :  { %v1040_v28 = vpop.permute.xlu0 %1039 }
0x185a   :  { %v1042_v29 = vmul.f32 %v2017_v27, %v1040_v28  ;;  %v1281_v28 = vld [vmem:[#allocation6 + $0x78] sm:$0x3f] }
0x185c   :  { %1044 = vrot.lane.b32.xlu1 %v1042_v29, %s2102_s26 }
0x18ce   :  { %v1045_v30 = vpop.permute.xlu1 %1044 }
0x18cf   :  { %v1047_v33 = vadd.f32 %v1045_v30, %v2248_v18  ;;  %v1090_v18 = vld [vmem:[%s2450_s2] sm:$0xff] }
0x18d0   :  { %1772 = vmatprep.mubr.msk.f32.mxu0 %vm163_vm3, %v1090_v18  ;;  %v1301_v30 = vld [vmem:[%s2452_s4] sm:$0x1]  ;;  %v1294_v18 = vld [vmem:[#allocation6 + $0xe0] sm:$0xff] }
0x18d1   :  { %2018 = vtanh.f32 %v1047_v33  ;;  %1773 = vmatmul.mubr.msk.f32.vlgmr.msra.gmra.mrb[8].mxu0 %vm163_vm3, %v1091_v52 }
0x18d2   :  { %1810 = vmatprep.mubr.msk.f32.mxu0 %vm2101_vm0, %v2100_v1  ;;  %1931 = vmatpush3.bf16.msra.mxu0 %v1930_v31  ;;  %v1086_v31 = vld [vmem:[#allocation4 + $0x48] sm:$0xff] }
0x18d3   :  { %1932 = vmatprep.subr.bf16.mxu0 %v2099_v0 }
0x18d6   :  { %1934 = vmatpush3.bf16.msra.mxu0 %v1933_v23 }
0x18d7   :  { %1935 = vmatprep.subr.bf16.mxu0 %v2099_v0 }
0x18d9   :  { %1811 = vmatmul.mubr.msk.f32.vlgmr.msra.gmra.mrb[10].mxu0 %vm163_vm3, %v1300_v48 }
0x18da   :  { %1845 = vmatprep.mubr.msk.f32.mxu0 %vm2101_vm0, %v2100_v1  ;;  %1937 = vmatpush3.bf16.msra.mxu0 %v1936_v6 }
0x18db   :  { %v2019_v13 = vpop.eup %2018  ;;  %1938 = vmatprep.subr.bf16.mxu0 %v2099_v0 }
0x18dc   :  { %v1050_v34 = vrot.slane %v2019_v13, 1 }
0x18de   :  { %v1052_v5 = vsub.f32 %v2371_v14, %v1050_v34  ;;  %v1273_v14 = vld [vmem:[#allocation6 + $0x38] sm:$0xff] }
0x18df   :  { %v1914_v16 = vpack.c.bf16 %v1273_v14, %v1272_v12  ;;  %v1285_v34 = vld [vmem:[#allocation6 + $0x98] sm:$0xff] }
0x18e0   :  { %v1054_v35 = vrot.slane %v1052_v5, 7 }
0x18e2   :  { %1055 = vrot.lane.b32.xlu0 %v1054_v35, %s2105_s28  ;;  %v1286_v35 = vld [vmem:[#allocation6 + $0xa0] sm:$0xff] }
0x18e3   :  { %v1942_v38 = vpack.c.bf16 %v1287_v36, %v1286_v35 }
0x1954   :  { %v1056_v50 = vpop.permute.xlu0 %1055 }
0x1955   :  { %v1058_v51 = vmul.f32 %v2017_v27, %v1056_v50  ;;  %v1923_v27 = vpack.c.bf16 %v1279_v26, %v1278_v25  ;;  %v1954_v50 = vpack.c.bf16 %v1295_v49, %v1294_v18 }
0x1957   :  { %1060 = vrot.lane.b32.xlu1 %v1058_v51, %s2104_s27 }
0x19a4   :  { %v2416_v7 = vpop.f32.mrb[8].mxu0 }
0x19a5   :  { %v1239_v33 = vpop.f32.mrb[9].mxu0 }
0x19ac   :  { %v1448_v51 = vpop.f32.mrb[10].mxu0 }
0x19ad   :  { %v1812_v52 = vpop.f32.mrb[11].mxu0 }
0x19c9   :  { %v1061_v58 = vpop.permute.xlu1 %1060 }
0x19ca   :  { %v1063_v60 = vadd.f32 %v2019_v13, %v1061_v58  ;;  %v1284_v13 = vld [vmem:[#allocation6 + $0x90] sm:$0xff]  ;;  %v1567_v58 = vld [vmem:[#allocation4 + $0x40] ss:$0 sm:$0xff] }
0x19cb   :  { %v1939_v5 = vpack.c.bf16 %v1285_v34, %v1284_v13 }
0x19cc   :  { %v1076_v62 = vsel %vm1075_vm9, %v1074_v61, %v1063_v60 }
0x19cd   :  { %1093 = vrot.lane.b32.xlu0 %v1076_v62, %s2102_s26  ;;  %1940 = vmatpush3.bf16.msra.mxu0 %v1939_v5 }
0x19ce   :  { %1941 = vmatprep.subr.bf16.mxu0 %v2099_v0 }
0x19d1   :  { %1943 = vmatpush3.bf16.msra.mxu0 %v1942_v38 }
0x19d2   :  { %1944 = vmatprep.subr.bf16.mxu0 %v2099_v0 }
0x19d5   :  { %1946 = vmatpush3.bf16.msra.mxu0 %v1945_v41 }
0x19d6   :  { %1947 = vmatprep.subr.bf16.mxu0 %v2099_v0 }
0x19d9   :  { %1949 = vmatpush3.bf16.msra.mxu0 %v1948_v43 }
0x19da   :  { %1950 = vmatprep.subr.bf16.mxu0 %v2099_v0 }
0x19dd   :  { %1952 = vmatpush3.bf16.msra.mxu0 %v1951_v47 }
0x19de   :  { %1953 = vmatprep.subr.bf16.mxu0 %v2099_v0 }
0x19e1   :  { %1955 = vmatpush3.bf16.msra.mxu0 %v1954_v50 }
0x19e2   :  { %1956 = vmatprep.subr.bf16.mxu0 %v2099_v0 }
0x19e5   :  { %1958 = vmatpush3.bf16.msra.mxu0 %v1957_v55 }
0x1a3f   :  { %v1094_v15 = vpop.permute.xlu0 %1093 }
0x1a40   :  { %1762 = vmatmul.mubr.msk.f32.vlgmr.msra.gmra.mrb[10].mxu1 %vm163_vm3, %v1094_v15 }
0x1a41   :  { %1912 = vmatpush3.bf16.msra.mxu1 %v1911_v11  ;;  %1799 = vmatprep.mubr.msk.f32.mxu1 %vm2101_vm0, %v2100_v1  ;;  %v1280_v1 = vld [vmem:[#allocation6 + $0x70] sm:$0xff] }
0x1a42   :  { %1913 = vmatprep.subr.bf16.mxu1 %v2099_v0  ;;  %v1926_v29 = vpack.c.bf16 %v1281_v28, %v1280_v1  ;;  %v1088_v11 = vld [vmem:[#allocation4 + $0x58] sm:$0xff] }
0x1a45   :  { %1915 = vmatpush3.bf16.msra.mxu1 %v1914_v16 }
0x1a46   :  { %1916 = vmatprep.subr.bf16.mxu1 %v2099_v0 }
0x1a49   :  { %1918 = vmatpush3.bf16.msra.mxu1 %v1917_v20 }
0x1a4a   :  { %1919 = vmatprep.subr.bf16.mxu1 %v2099_v0 }
0x1a4d   :  { %1921 = vmatpush3.bf16.msra.mxu1 %v1920_v24 }
0x1a4e   :  { %1922 = vmatprep.subr.bf16.mxu1 %v2099_v0 }
0x1a51   :  { %1924 = vmatpush3.bf16.msra.mxu1 %v1923_v27 }
0x1a52   :  { %1925 = vmatprep.subr.bf16.mxu1 %v2099_v0  ;;  %v1298_v0 = vld [vmem:[#allocation6 + $0x100] sm:$0x1] }
0x1a55   :  { %1928 = vmatpush3.bf16.msk.msra.mxu1 %vm1927_vm11, %v1926_v29 }
0x1a58   :  { %1800 = vmatmul.mubr.msk.f32.vlgmr.msra.gmra.mrb[12].mxu1 %vm1302_vm12, %v1301_v30 }
0x1b13   :  { %v1163_v56 = vpop.f32.mrb[10].mxu1 }
0x1b14   :  { %v1245_v59 = vadd.f32 %v2416_v7, %v1163_v56  ;;  %v1240_v60 = vadd.f32 %v1239_v33, %v1163_v56  ;;  %v1763_v61 = vpop.f32.mrb[11].mxu1  ;;  %v1089_v7 = vld [vmem:[#allocation4 + $0x60] sm:$0xff] }
0x1b16   :  { %v1252_v62 = vadd.f32 %v1567_v58, %v1240_v60  ;;  %v1253_v44 = vadd.f32 %v1567_v58, %v1245_v59 }
0x1b18   :  { %v1254_v57 = vmax.f32 %v1252_v62, 0.0  ;;  %v1255_v63 = vmax.f32 %v1253_v44, 0.0 }
0x1b1a   :  { %v1257_v23 = vmul.f32 %v1255_v63, %v1087_v4  ;;  %v1256_v48 = vmul.f32 %v1254_v57, %v1086_v31 }
0x1b1c   :  { %1260 = vadd.xlane.f32.xlu0 %v1257_v23  ;;  %1258 = vadd.xlane.f32.xlu1 %v1256_v48 }
0x1b2b   :  { %v1375_v2 = vpop.f32.mrb[12].mxu1 }
0x1b2c   :  { %v1449_v3 = vadd.f32 %v1448_v51, %v1375_v2  ;;  %v1801_v6 = vpop.f32.mrb[13].mxu1 }
0x1b2e   :  { %v1452_v8 = vadd.f32 %v1449_v3, %v1298_v0 }
0x1b30   :  { %v1453_v10 = vmax.f32 %v1452_v8, 0.0 }
0x1b32   :  { %1846 = vmatmul.mubr.f32.vlgmr.msra.gmra.mrb[12].mxu0 %v1453_v10 }
0x1ba9   :  { %v1261_v12 = vpop.xlane.xlu0 %1260  ;;  %v1259_v14 = vpop.xlane.xlu1 %1258 }
0x1baa   :  { %v1263_v15 = vadd.f32 %v1261_v12, %v1089_v7  ;;  %v1262_v16 = vadd.f32 %v1259_v14, %v1088_v11 }
0x1bac   :  { %1265 = vst [vmem:[%s2456_s8 + $0x8] sm:$0xff] %v1263_v15  ;;  %1264 = vst [vmem:[%s2456_s8] sm:$0xff] %v1262_v16 }
0x1c05   :  { %v1520_v19 = vpop.f32.mrb[12].mxu0 }
0x1c06   :  { %v1521_v20 = vadd.f32 %v1520_v19, %v1299_v17  ;;  %v1847_v21 = vpop.f32.mrb[13].mxu0 }
0x1c08   :  { %v1571_v22 = vmul.f32 -1.442695, %v1521_v20 }
0x1c0a   :  { %2020 = vpow2.f32 %v1571_v22 }
0x1c14   :  { %v2021_v24 = vpop.eup %2020 }
0x1c15   :  { %v1527_v25 = vadd.f32 1.0, %v2021_v24 }
0x1c17   :  { %2022 = vrcp.f32 %v1527_v25 }
0x1c21   :  { %v2023_v26 = vpop.eup %2022 }
0x1c22   :  { %v1533_v27 = vrot.slane %v2023_v26, %v277_v37 }
0x1c24   :  { %1534 = vst [vmem:[%s2457_s9] sm:$0xff] %v1533_v27 }
0x1c25   :  { %1543 = vsyncpa [#allocation3], 1 }
0x1c26   :  { %1544 = vsyncpa [#allocation5], 1 }

</bundles_post_ra>
